<compile_context>
chip_gen: v7x
topology: tpu7x:2x2x1
jax: 0.10.0
libtpu: 0.0.40
codegen_flags: <defaults>
</compile_context>

<pallas_src>
import functools
import math

import jax
import jax.numpy as jnp
from jax.experimental import pallas as pl
from jax.experimental.pallas import tpu as pltpu

LANE = 128      # TPU vreg lane width  (last dim of a tile)
SUBLANE = 8     # TPU vreg sublane width (second-to-last dim of a tile)


# ---------------------------------------------------------------------------
# Pallas kernel: one grid step = load a VMEM tile, apply the wrapped callable,
# store the result.  `func` is traced into the kernel body (fully fused).
# ---------------------------------------------------------------------------
def _lambda_kernel(x_ref, o_ref, *, func):
    o_ref[...] = func(x_ref[...]).astype(o_ref.dtype)


def _row_tile(rows, max_rows):
    """Largest row tile <= max_rows that divides `rows` (both multiples of 8)."""
    tr = min(rows, max_rows)
    while rows % tr:
        tr -= SUBLANE
    return tr


def _out_dtype(func, block_shape, in_dtype):
    """Output dtype of the lambda (abstract eval only; no compute)."""
    return jax.eval_shape(func, jax.ShapeDtypeStruct(block_shape, in_dtype)).dtype


# ---------------------------------------------------------------------------
# pallas_call wrappers
# ---------------------------------------------------------------------------
def _apply_elementwise(func, x, *, max_rows=1024):
    """func acts pointwise: retile the tensor as a lane-dense (rows, cols) slab."""
    orig_shape, n = x.shape, x.size
    # Widest power-of-two lane count (128..1024) that still yields at least one
    # full (SUBLANE, cols) tile -> lane-dense, unmasked loads/stores.
    cols = LANE
    for cand in (1024, 512, 256, 128):
        if n >= SUBLANE * cand:
            cols = cand
            break
    rows = pl.cdiv(pl.cdiv(n, cols), SUBLANE) * SUBLANE
    flat = x.reshape(-1)
    pad = rows * cols - n
    if pad:
        flat = jnp.pad(flat, (0, pad))          # padded tail is sliced away below
    x2d = flat.reshape(rows, cols)

    tr = _row_tile(rows, max_rows)
    odt = _out_dtype(func, (tr, cols), x.dtype)
    out2d = pl.pallas_call(
        functools.partial(_lambda_kernel, func=func),
        grid=(rows // tr,),
        in_specs=[pl.BlockSpec((tr, cols), lambda i: (i, 0))],
        out_specs=pl.BlockSpec((tr, cols), lambda i: (i, 0)),
        out_shape=jax.ShapeDtypeStruct((rows, cols), odt),
        compiler_params=pltpu.CompilerParams(
            dimension_semantics=("parallel",)),
    )(x2d)
    return out2d.reshape(-1)[:n].reshape(orig_shape)


def _apply_rowwise(func, x, *, max_rows=512):
    """func needs whole rows (e.g. softmax over dim=-1): tile leading axes only."""
    orig_shape = x.shape
    d = orig_shape[-1]
    m = math.prod(orig_shape[:-1]) if len(orig_shape) > 1 else 1
    x2d = x.reshape(m, d)
    mp = pl.cdiv(m, SUBLANE) * SUBLANE
    if mp != m:
        x2d = jnp.pad(x2d, ((0, mp - m), (0, 0)))   # padded rows sliced away below

    tr = _row_tile(mp, max_rows)
    odt = _out_dtype(func, (tr, d), x.dtype)
    out2d = pl.pallas_call(
        functools.partial(_lambda_kernel, func=func),
        grid=(mp // tr,),
        in_specs=[pl.BlockSpec((tr, d), lambda i: (i, 0))],   # full last axis per block
        out_specs=pl.BlockSpec((tr, d), lambda i: (i, 0)),
        out_shape=jax.ShapeDtypeStruct((mp, d), odt),
        compiler_params=pltpu.CompilerParams(
            dimension_semantics=("parallel",)),
    )(x2d)
    return out2d[:m].reshape(orig_shape)


class LambdaBlock:
    """Pallas port of the PyTorch LambdaBlock: forward(X) = func(X).

    `func` must be a JAX-traceable, shape-preserving callable (jnp / lax ops);
    it is traced once inside the Pallas kernel body so the whole lambda runs
    fused on VMEM tiles.
      elementwise=True  -> tensor is retiled as a flat lane-dense slab.
      elementwise=False -> func needs the full last axis per row (softmax etc.).
    """

    def __init__(self, func, *, elementwise=True):
        self.func = func
        self.elementwise = elementwise

    def __call__(self, x):
        if self.elementwise:
            return _apply_elementwise(self.func, x)
        return _apply_rowwise(self.func, x)


# ---------------------------------------------------------------------------
# Demo / self-test
# ---------------------------------------------------------------------------
if __name__ == "__main__":
    # Shapes consistent with the AllCNN2D context: batch=2, channels=4, 16x16.
    batch, cin, hh, ww = 2, 4, 16, 16
    key = jax.random.PRNGKey(0)
    kx, km = jax.random.split(key)
    x = jax.random.normal(kx, (batch, cin, hh, ww), dtype=jnp.float32)
    # Sprinkle NaNs so the NaN-scrubbing lambda has work to do.
    x = jnp.where(jax.random.bernoulli(km, 0.05, x.shape), jnp.nan, x)

    # Two LambdaBlock instantiations of the kind AllCNN2D wraps:
    #   1. torch.where(torch.isnan(X), torch.zeros_like(X), X)   (elementwise)
    #   2. softmax(X, dim=-1)                                    (row-wise)
    nan_scrub = LambdaBlock(
        lambda v: jnp.where(jnp.isnan(v), jnp.zeros_like(v), v))

    def _softmax_last(v):
        e = jnp.exp(v - jnp.max(v, axis=-1, keepdims=True))
        return e / jnp.sum(e, axis=-1, keepdims=True)

    row_softmax = LambdaBlock(_softmax_last, elementwise=False)

    @jax.jit
    def forward(inp):
        cleaned = nan_scrub(inp)
        probs = row_softmax(cleaned)
        return cleaned, probs

    cleaned, probs = forward(x)
    jax.block_until_ready((cleaned, probs))

    # Plain-JAX references.
    ref_cleaned = jnp.where(jnp.isnan(x), 0.0, x)
    ref_probs = jax.nn.softmax(ref_cleaned, axis=-1)

    assert cleaned.shape == x.shape and probs.shape == x.shape
    assert not bool(jnp.any(jnp.isnan(cleaned)))
    assert bool(jnp.allclose(cleaned, ref_cleaned, atol=1e-6, rtol=1e-6))
    assert bool(jnp.allclose(probs, ref_probs, atol=1e-5, rtol=1e-5))
    assert bool(jnp.allclose(jnp.sum(probs, axis=-1), 1.0, atol=1e-5))
    # TODO(synk): LambdaBlock accepts arbitrary Python callables; only
    # JAX-traceable, shape-preserving funcs can be fused into the Pallas body.
    print("KERNEL_OK")
</pallas_src>

<mosaic_0001>
module attributes {stable_mosaic.version = 11 : i64} {
  func.func @_lambda_kernel(%arg0: i32, %arg1: memref<128x16xf32, #tpu.memory_space<vmem>>, %arg2: memref<128x16xf32, #tpu.memory_space<vmem>>) attributes {dimension_semantics = [#tpu.dimension_semantics<parallel>], iteration_bounds = array<i64: 1>, scalar_prefetch = 0 : i64, scratch_operands = 0 : i64, tpu.core_type = #tpu.core_type<tc>, window_params = [{transform_indices = @transform_0, window_bounds = array<i64: 128, 16>}, {transform_indices = @transform_1, window_bounds = array<i64: 128, 16>}]} {
    %c0 = arith.constant 0 : index
    %c0_0 = arith.constant 0 : index
    %0 = vector.load %arg1[%c0, %c0_0] : memref<128x16xf32, #tpu.memory_space<vmem>>, vector<128x16xf32>
    %cst = arith.constant dense<0xFF800000> : vector<128xf32>
    %1 = vector.multi_reduction <maximumf>, %0, %cst [1] : vector<128x16xf32> to vector<128xf32>
    %2 = vector.shape_cast %1 : vector<128xf32> to vector<128x1xf32>
    %3 = vector.broadcast %2 : vector<128x1xf32> to vector<128x16xf32>
    %4 = arith.subf %0, %3 : vector<128x16xf32>
    %5 = math.exp %4 : vector<128x16xf32>
    %cst_1 = arith.constant dense<0.000000e+00> : vector<128xf32>
    %6 = vector.multi_reduction <add>, %5, %cst_1 [1] : vector<128x16xf32> to vector<128xf32>
    %7 = vector.shape_cast %6 : vector<128xf32> to vector<128x1xf32>
    %8 = vector.broadcast %7 : vector<128x1xf32> to vector<128x16xf32>
    %9 = arith.divf %5, %8 : vector<128x16xf32>
    %c0_2 = arith.constant 0 : index
    %c0_3 = arith.constant 0 : index
    %10 = vector.load %arg2[%c0_2, %c0_3] : memref<128x16xf32, #tpu.memory_space<vmem>>, vector<128x16xf32>
    tpu.vector_store %arg2[%c0_2, %c0_3], %9 {strides = array<i32>} : memref<128x16xf32, #tpu.memory_space<vmem>>, vector<128x16xf32>,
    return
  }
  func.func @transform_0(%arg0: i32) -> (i32, i32) {
    %c0_i32 = arith.constant 0 : i32
    %c0_i32_0 = arith.constant 0 : i32
    return %arg0, %c0_i32 : i32, i32
  }
  func.func @transform_1(%arg0: i32) -> (i32, i32) {
    %c0_i32 = arith.constant 0 : i32
    %c0_i32_0 = arith.constant 0 : i32
    return %arg0, %c0_i32 : i32, i32
  }
}

module attributes {stable_mosaic.version = 11 : i64} {
  func.func @_lambda_kernel(%arg0: i32, %arg1: memref<8x256xf32, #tpu.memory_space<vmem>>, %arg2: memref<8x256xf32, #tpu.memory_space<vmem>>) attributes {dimension_semantics = [#tpu.dimension_semantics<parallel>], iteration_bounds = array<i64: 1>, scalar_prefetch = 0 : i64, scratch_operands = 0 : i64, tpu.core_type = #tpu.core_type<tc>, window_params = [{transform_indices = @transform_0, window_bounds = array<i64: 8, 256>}, {transform_indices = @transform_1, window_bounds = array<i64: 8, 256>}]} {
    %c0 = arith.constant 0 : index
    %c0_0 = arith.constant 0 : index
    %0 = vector.load %arg1[%c0, %c0_0] : memref<8x256xf32, #tpu.memory_space<vmem>>, vector<8x256xf32>
    %1 = arith.cmpf one, %0, %0 : vector<8x256xf32>
    %cst = arith.constant 0.000000e+00 : f32
    %2 = vector.broadcast %cst : f32 to vector<8x256xf32>
    %3 = arith.select %1, %2, %0 : vector<8x256xi1>, vector<8x256xf32>
    %c0_1 = arith.constant 0 : index
    %c0_2 = arith.constant 0 : index
    %4 = vector.load %arg2[%c0_1, %c0_2] : memref<8x256xf32, #tpu.memory_space<vmem>>, vector<8x256xf32>
    tpu.vector_store %arg2[%c0_1, %c0_2], %3 {strides = array<i32>} : memref<8x256xf32, #tpu.memory_space<vmem>>, vector<8x256xf32>,
    return
  }
  func.func @transform_0(%arg0: i32) -> (i32, i32) {
    %c0_i32 = arith.constant 0 : i32
    %c0_i32_0 = arith.constant 0 : i32
    return %arg0, %c0_i32 : i32, i32
  }
  func.func @transform_1(%arg0: i32) -> (i32, i32) {
    %c0_i32 = arith.constant 0 : i32
    %c0_i32_0 = arith.constant 0 : i32
    return %arg0, %c0_i32 : i32, i32
  }
}

</mosaic_0001>

<bundles_post_ra>
// kernel: forward.2
= control target key start
LH: loop header
LB: loop body
LE: loop exit
PB: predicated region body
PF: predicated region fallthrough
CT: control target
= control target key end

     0   :  { %s42_s0 = inlined_call_operand.vmem [shape: f32[8,256], index: 0, kind: input, shape index: {}]   ;;  %s43_s1 = inlined_call_operand.vmem [shape: f32[8,256], index: 1, kind: output, shape index: {}]  }
   0x1   :  { %v8_v0 = vld [vmem:[%s42_s0] sm:$0xff]  ;;  %v9_v1 = vld [vmem:[%s42_s0 + $0x8] sm:$0xff] }
   0x2   :  { %vm10_vm0 = vcmp.ne.f32.partialorder %v8_v0, %v8_v0  ;;  %vm11_vm1 = vcmp.ne.f32.partialorder %v9_v1, %v9_v1 }
   0x3   :  { %v12_v2 = vsel %vm10_vm0, 0.0, %v8_v0  ;;  %v13_v3 = vsel %vm11_vm1, 0.0, %v9_v1 }
   0x4   :  { %14 = vst [vmem:[%s43_s1] sm:$0xff] %v12_v2  ;;  %15 = vst [vmem:[%s43_s1 + $0x8] sm:$0xff] %v13_v3 }

// kernel: forward.3
= control target key start
LH: loop header
LB: loop body
LE: loop exit
PB: predicated region body
PF: predicated region fallthrough
CT: control target
= control target key end

     0   :  { %vm25_vm0 = vcmask 130048   ;;  %s542_s0 = inlined_call_operand.vmem [shape: f32[128,16], index: 0, kind: input, shape index: {}]   ;;  %s543_s1 = inlined_call_operand.hbm [shape: f32[128,16], index: 1, kind: output, shape index: {}]  }
   0x1   :  { %v9_v0 = vld [vmem:[%s542_s0] sm:$0xff]  ;;  %v11_v1 = vld [vmem:[%s542_s0 + $0x10] sm:$0xff]  ;;  %v10_v2 = vld [vmem:[%s542_s0 + $0x8] sm:$0xff] }
   0x2   :  { %v26_v3 = vsel %vm25_vm0, %v9_v0, -inf  ;;  %v32_v4 = vsel %vm25_vm0, %v11_v1, -inf  ;;  %v12_v5 = vld [vmem:[%s542_s0 + $0x18] sm:$0xff]  ;;  %v29_v6 = vsel %vm25_vm0, %v10_v2, -inf  ;;  %v13_v8 = vld [vmem:[%s542_s0 + $0x20] sm:$0xff]  ;;  %v14_v9 = vld [vmem:[%s542_s0 + $0x28] sm:$0xff] }
   0x3   :  { %27 = vmax.xlane.f32.xlu0 %v26_v3  ;;  %33 = vmax.xlane.f32.xlu1 %v32_v4  ;;  %v35_v7 = vsel %vm25_vm0, %v12_v5, -inf }
   0x4   :  { %6 = vsyncpa [#allocation3], 0  ;;  %v38_v10 = vsel %vm25_vm0, %v13_v8, -inf  ;;  %v41_v11 = vsel %vm25_vm0, %v14_v9, -inf  ;;  %v15_v12 = vld [vmem:[%s542_s0 + $0x30] sm:$0xff]  ;;  %v16_v13 = vld [vmem:[%s542_s0 + $0x38] sm:$0xff] }
   0x5   :  { %v44_v14 = vsel %vm25_vm0, %v15_v12, -inf  ;;  %v47_v15 = vsel %vm25_vm0, %v16_v13, -inf  ;;  %v373_v16 = vld [vmem:[%s542_s0 + $0x40] sm:$0xff]  ;;  %v378_v17 = vld [vmem:[%s542_s0 + $0x48] sm:$0xff]  ;;  %v387_v20 = vld [vmem:[%s542_s0 + $0x50] sm:$0xff] }
   0x6   :  { %v50_v18 = vsel %vm25_vm0, %v373_v16, -inf  ;;  %v53_v19 = vsel %vm25_vm0, %v378_v17, -inf  ;;  %v392_v21 = vld [vmem:[%s542_s0 + $0x58] sm:$0xff]  ;;  %v56_v22 = vsel %vm25_vm0, %v387_v20, -inf  ;;  %v401_v24 = vld [vmem:[%s542_s0 + $0x60] sm:$0xff]  ;;  %v406_v25 = vld [vmem:[%s542_s0 + $0x68] sm:$0xff] }
   0x7   :  { %30 = vmax.xlane.f32.xlu0 %v29_v6  ;;  %36 = vmax.xlane.f32.xlu1 %v35_v7  ;;  %v59_v23 = vsel %vm25_vm0, %v392_v21, -inf  ;;  %v62_v26 = vsel %vm25_vm0, %v401_v24, -inf  ;;  %v65_v27 = vsel %vm25_vm0, %v406_v25, -inf  ;;  %v415_v28 = vld [vmem:[%s542_s0 + $0x70] sm:$0xff]  ;;  %v420_v29 = vld [vmem:[%s542_s0 + $0x78] sm:$0xff]  ;;  %s325_s0 = smov [#allocation2]  }
   0x8   :  { %v68_v30 = vsel %vm25_vm0, %v415_v28, -inf  ;;  %v71_v31 = vsel %vm25_vm0, %v420_v29, -inf  ;;  %s223_s9 = sshll.u32 %s325_s0, 4  ;;  %s224_s9 = int_to_ptr.vmem [resolvable:$true] %s223_s9 }
   0x9   :  { %s301_s10 = scalar_lea.vmem %s224_s9, 2048  ;;  %p306_p1 = scmp.lt.s32.totalorder %s224_s9, %s224_s9 }
   0xa   :  { %p302_p0 = scmp.ne.s32.totalorder %s224_s9, %s301_s10  ;;  %p307_p2 = scmp.lt.s32.totalorder %s301_s10, %s301_s10 }
   0xb   :  { %39 = vmax.xlane.f32.xlu0 %v38_v10  ;;  %42 = vmax.xlane.f32.xlu1 %v41_v11 }
   0xc   :  { %p308_p3 = por %p307_p2, %p306_p1 }
   0xe   :  { %p309_p4 = pnand %p308_p3, %p302_p0 }
   0xf   :  { %45 = vmax.xlane.f32.xlu0 %v44_v14  ;;  %48 = vmax.xlane.f32.xlu1 %v47_v15 }
  0x13   :  { %51 = vmax.xlane.f32.xlu0 %v50_v18  ;;  %54 = vmax.xlane.f32.xlu1 %v53_v19 }
  0x17   :  { %57 = vmax.xlane.f32.xlu0 %v56_v22  ;;  %60 = vmax.xlane.f32.xlu1 %v59_v23 }
  0x1b   :  { %63 = vmax.xlane.f32.xlu0 %v62_v26  ;;  %66 = vmax.xlane.f32.xlu1 %v65_v27 }
  0x1f   :  { %69 = vmax.xlane.f32.xlu0 %v68_v30  ;;  %72 = vmax.xlane.f32.xlu1 %v71_v31 }
  0x90   :  { %v28_v32 = vpop.xlane.xlu0 %27  ;;  %v34_v33 = vpop.xlane.xlu1 %33 }
  0x91   :  { %v74_v34 = vsub.f32 %v9_v0, %v28_v32  ;;  %v76_v35 = vsub.f32 %v11_v1, %v34_v33 }
  0x93   :  { %v90_v36 = vmul.f32 1.442695, %v74_v34  ;;  %v94_v37 = vmul.f32 1.442695, %v76_v35 }
  0x94   :  { %v31_v38 = vpop.xlane.xlu0 %30  ;;  %v37_v39 = vpop.xlane.xlu1 %36 }
  0x95   :  { %237 = vpow2.f32 %v90_v36  ;;  %v75_v40 = vsub.f32 %v10_v2, %v31_v38  ;;  %v77_v41 = vsub.f32 %v12_v5, %v37_v39 }
  0x96   :  { %239 = vpow2.f32 %v94_v37 }
  0x97   :  { %v92_v42 = vmul.f32 1.442695, %v75_v40  ;;  %v96_v43 = vmul.f32 1.442695, %v77_v41 }
  0x98   :  { %v40_v44 = vpop.xlane.xlu0 %39  ;;  %v43_v45 = vpop.xlane.xlu1 %42 }
  0x99   :  { %241 = vpow2.f32 %v92_v42  ;;  %v78_v46 = vsub.f32 %v13_v8, %v40_v44  ;;  %v79_v47 = vsub.f32 %v14_v9, %v43_v45 }
  0x9a   :  { %243 = vpow2.f32 %v96_v43 }
  0x9b   :  { %v98_v48 = vmul.f32 1.442695, %v78_v46  ;;  %v100_v49 = vmul.f32 1.442695, %v79_v47 }
  0x9c   :  { %v46_v50 = vpop.xlane.xlu0 %45  ;;  %v49_v51 = vpop.xlane.xlu1 %48 }
  0x9d   :  { %245 = vpow2.f32 %v98_v48  ;;  %v80_v52 = vsub.f32 %v15_v12, %v46_v50  ;;  %v81_v53 = vsub.f32 %v16_v13, %v49_v51 }
  0x9e   :  { %247 = vpow2.f32 %v100_v49 }
  0x9f   :  { %v426_v54 = vpop.eup %237  ;;  %v102_v55 = vmul.f32 1.442695, %v80_v52  ;;  %v104_v56 = vmul.f32 1.442695, %v81_v53 }
  0xa0   :  { %v428_v57 = vpop.eup %239  ;;  %v52_v58 = vpop.xlane.xlu0 %51  ;;  %v122_v59 = vsel %vm25_vm0, %v426_v54, 0.0 }
  0xa1   :  { %v55_v60 = vpop.xlane.xlu1 %54  ;;  %249 = vpow2.f32 %v102_v55  ;;  %v82_v61 = vsub.f32 %v373_v16, %v52_v58  ;;  %123 = vadd.xlane.f32.xlu0 %v122_v59  ;;  %v128_v63 = vsel %vm25_vm0, %v428_v57, 0.0 }
  0xa2   :  { %v83_v62 = vsub.f32 %v378_v17, %v55_v60  ;;  %251 = vpow2.f32 %v104_v56 }
  0xa3   :  { %v436_v0 = vpop.eup %241  ;;  %v106_v1 = vmul.f32 1.442695, %v82_v61 }
  0xa4   :  { %v108_v2 = vmul.f32 1.442695, %v83_v62  ;;  %v438_v3 = vpop.eup %243  ;;  %v58_v4 = vpop.xlane.xlu0 %57  ;;  %v125_v5 = vsel %vm25_vm0, %v436_v0, 0.0 }
  0xa5   :  { %v61_v6 = vpop.xlane.xlu1 %60  ;;  %253 = vpow2.f32 %v106_v1  ;;  %v84_v7 = vsub.f32 %v387_v20, %v58_v4  ;;  %129 = vadd.xlane.f32.xlu0 %v128_v63  ;;  %126 = vadd.xlane.f32.xlu1 %v125_v5  ;;  %v131_v9 = vsel %vm25_vm0, %v438_v3, 0.0 }
  0xa6   :  { %v85_v8 = vsub.f32 %v392_v21, %v61_v6  ;;  %255 = vpow2.f32 %v108_v2 }
  0xa7   :  { %v446_v10 = vpop.eup %245  ;;  %v110_v11 = vmul.f32 1.442695, %v84_v7 }
  0xa8   :  { %v112_v12 = vmul.f32 1.442695, %v85_v8  ;;  %v448_v13 = vpop.eup %247  ;;  %v64_v14 = vpop.xlane.xlu0 %63  ;;  %v134_v15 = vsel %vm25_vm0, %v446_v10, 0.0 }
  0xa9   :  { %v67_v16 = vpop.xlane.xlu1 %66  ;;  %257 = vpow2.f32 %v110_v11  ;;  %v86_v17 = vsub.f32 %v401_v24, %v64_v14  ;;  %132 = vadd.xlane.f32.xlu1 %v131_v9  ;;  %135 = vadd.xlane.f32.xlu0 %v134_v15  ;;  %v137_v19 = vsel %vm25_vm0, %v448_v13, 0.0 }
  0xaa   :  { %v87_v18 = vsub.f32 %v406_v25, %v67_v16  ;;  %259 = vpow2.f32 %v112_v12 }
  0xab   :  { %v456_v20 = vpop.eup %249  ;;  %v114_v21 = vmul.f32 1.442695, %v86_v17 }
  0xac   :  { %v116_v22 = vmul.f32 1.442695, %v87_v18  ;;  %v458_v23 = vpop.eup %251  ;;  %v70_v26 = vpop.xlane.xlu0 %69  ;;  %v140_v27 = vsel %vm25_vm0, %v456_v20, 0.0 }
  0xad   :  { %v73_v30 = vpop.xlane.xlu1 %72  ;;  %261 = vpow2.f32 %v114_v21  ;;  %v88_v24 = vsub.f32 %v415_v28, %v70_v26  ;;  %138 = vadd.xlane.f32.xlu1 %v137_v19  ;;  %141 = vadd.xlane.f32.xlu0 %v140_v27  ;;  %v143_v31 = vsel %vm25_vm0, %v458_v23, 0.0 }
  0xae   :  { %v89_v25 = vsub.f32 %v420_v29, %v73_v30  ;;  %263 = vpow2.f32 %v116_v22 }
  0xaf   :  { %v466_v32 = vpop.eup %253  ;;  %v118_v33 = vmul.f32 1.442695, %v88_v24 }
  0xb0   :  { %v120_v34 = vmul.f32 1.442695, %v89_v25  ;;  %v468_v35 = vpop.eup %255  ;;  %v146_v36 = vsel %vm25_vm0, %v466_v32, 0.0 }
  0xb1   :  { %265 = vpow2.f32 %v118_v33  ;;  %144 = vadd.xlane.f32.xlu1 %v143_v31  ;;  %147 = vadd.xlane.f32.xlu0 %v146_v36  ;;  %v149_v28 = vsel %vm25_vm0, %v468_v35, 0.0 }
  0xb2   :  { %267 = vpow2.f32 %v120_v34 }
  0xb3   :  { %v474_v29 = vpop.eup %257 }
  0xb4   :  { %v476_v37 = vpop.eup %259  ;;  %v152_v38 = vsel %vm25_vm0, %v474_v29, 0.0 }
  0xb5   :  { %150 = vadd.xlane.f32.xlu1 %v149_v28  ;;  %153 = vadd.xlane.f32.xlu0 %v152_v38  ;;  %v155_v39 = vsel %vm25_vm0, %v476_v37, 0.0 }
  0xb7   :  { %v482_v40 = vpop.eup %261 }
  0xb8   :  { %v484_v41 = vpop.eup %263  ;;  %v158_v42 = vsel %vm25_vm0, %v482_v40, 0.0 }
  0xb9   :  { %156 = vadd.xlane.f32.xlu1 %v155_v39  ;;  %159 = vadd.xlane.f32.xlu0 %v158_v42  ;;  %v161_v43 = vsel %vm25_vm0, %v484_v41, 0.0 }
  0xbb   :  { %v490_v44 = vpop.eup %265 }
  0xbc   :  { %v492_v45 = vpop.eup %267  ;;  %v164_v46 = vsel %vm25_vm0, %v490_v44, 0.0 }
  0xbd   :  { %162 = vadd.xlane.f32.xlu1 %v161_v43  ;;  %165 = vadd.xlane.f32.xlu0 %v164_v46  ;;  %v167_v47 = vsel %vm25_vm0, %v492_v45, 0.0 }
  0xc1   :  { %168 = vadd.xlane.f32.xlu1 %v167_v47 }
 0x12e   :  { %v124_v48 = vpop.xlane.xlu0 %123 }
 0x12f   :  { %269 = vrcp.f32 %v124_v48 }
 0x132   :  { %v127_v49 = vpop.xlane.xlu1 %126  ;;  %v130_v50 = vpop.xlane.xlu0 %129 }
 0x133   :  { %271 = vrcp.f32 %v127_v49 }
 0x134   :  { %273 = vrcp.f32 %v130_v50 }
 0x136   :  { %v133_v51 = vpop.xlane.xlu1 %132  ;;  %v136_v52 = vpop.xlane.xlu0 %135 }
 0x137   :  { %275 = vrcp.f32 %v133_v51 }
 0x138   :  { %277 = vrcp.f32 %v136_v52 }
 0x139   :  { %v270_v53 = vpop.eup %269 }
 0x13a   :  { %v171_v55 = vmul.f32 %v270_v53, %v426_v54  ;;  %v139_v56 = vpop.xlane.xlu1 %138  ;;  %v142_v58 = vpop.xlane.xlu0 %141 }
 0x13b   :  { %279 = vrcp.f32 %v139_v56 }
 0x13c   :  { %202 = vst.msk [vmem:[#allocation2] sm:$0xff] %vm25_vm0, %v171_v55  ;;  %281 = vrcp.f32 %v142_v58 }
 0x13d   :  { %v272_v59 = vpop.eup %271 }
 0x13e   :  { %v274_v60 = vpop.eup %273  ;;  %v173_v61 = vmul.f32 %v272_v59, %v436_v0  ;;  %v145_v62 = vpop.xlane.xlu1 %144 }
 0x13f   :  { %v148_v63 = vpop.xlane.xlu0 %147  ;;  %v175_v1 = vmul.f32 %v274_v60, %v428_v57  ;;  %283 = vrcp.f32 %v145_v62 }
 0x140   :  { %203 = vst.msk [vmem:[#allocation2 + $0x8] sm:$0xff] %vm25_vm0, %v173_v61  ;;  %285 = vrcp.f32 %v148_v63 }
 0x141   :  { %v276_v2 = vpop.eup %275  ;;  %204 = vst.msk [vmem:[#allocation2 + $0x10] sm:$0xff] %vm25_vm0, %v175_v1 }
 0x142   :  { %v278_v54 = vpop.eup %277  ;;  %v177_v4 = vmul.f32 %v276_v2, %v438_v3  ;;  %v151_v5 = vpop.xlane.xlu1 %150 }
 0x143   :  { %v154_v6 = vpop.xlane.xlu0 %153  ;;  %v179_v7 = vmul.f32 %v278_v54, %v446_v10  ;;  %287 = vrcp.f32 %v151_v5 }
 0x144   :  { %205 = vst.msk [vmem:[#allocation2 + $0x18] sm:$0xff] %vm25_vm0, %v177_v4  ;;  %289 = vrcp.f32 %v154_v6 }
 0x145   :  { %v280_v0 = vpop.eup %279  ;;  %206 = vst.msk [vmem:[#allocation2 + $0x20] sm:$0xff] %vm25_vm0, %v179_v7 }
 0x146   :  { %v282_v57 = vpop.eup %281  ;;  %v181_v8 = vmul.f32 %v280_v0, %v448_v13  ;;  %v157_v9 = vpop.xlane.xlu1 %156 }
 0x147   :  { %v160_v11 = vpop.xlane.xlu0 %159  ;;  %v183_v12 = vmul.f32 %v282_v57, %v456_v20  ;;  %291 = vrcp.f32 %v157_v9 }
 0x148   :  { %207 = vst.msk [vmem:[#allocation2 + $0x28] sm:$0xff] %vm25_vm0, %v181_v8  ;;  %293 = vrcp.f32 %v160_v11 }
 0x149   :  { %v284_v3 = vpop.eup %283  ;;  %208 = vst.msk [vmem:[#allocation2 + $0x30] sm:$0xff] %vm25_vm0, %v183_v12 }
 0x14a   :  { %v286_v10 = vpop.eup %285  ;;  %v185_v14 = vmul.f32 %v284_v3, %v458_v23  ;;  %v163_v15 = vpop.xlane.xlu1 %162 }
 0x14b   :  { %v166_v16 = vpop.xlane.xlu0 %165  ;;  %v187_v17 = vmul.f32 %v286_v10, %v466_v32  ;;  %295 = vrcp.f32 %v163_v15 }
 0x14c   :  { %209 = vst.msk [vmem:[#allocation2 + $0x38] sm:$0xff] %vm25_vm0, %v185_v14  ;;  %297 = vrcp.f32 %v166_v16 }
 0x14d   :  { %v288_v13 = vpop.eup %287  ;;  %210 = vst.msk [vmem:[#allocation2 + $0x40] sm:$0xff] %vm25_vm0, %v187_v17 }
 0x14e   :  { %v290_v18 = vpop.eup %289  ;;  %v189_v19 = vmul.f32 %v288_v13, %v468_v35  ;;  %v169_v20 = vpop.xlane.xlu1 %168 }
 0x14f   :  { %v191_v21 = vmul.f32 %v290_v18, %v474_v29  ;;  %299 = vrcp.f32 %v169_v20 }
 0x150   :  { %211 = vst.msk [vmem:[#allocation2 + $0x48] sm:$0xff] %vm25_vm0, %v189_v19 }
 0x151   :  { %v292_v22 = vpop.eup %291  ;;  %212 = vst.msk [vmem:[#allocation2 + $0x50] sm:$0xff] %vm25_vm0, %v191_v21 }
 0x152   :  { %v294_v23 = vpop.eup %293  ;;  %v193_v26 = vmul.f32 %v292_v22, %v476_v37 }
 0x153   :  { %v195_v27 = vmul.f32 %v294_v23, %v482_v40 }
 0x154   :  { %213 = vst.msk [vmem:[#allocation2 + $0x58] sm:$0xff] %vm25_vm0, %v193_v26 }
 0x155   :  { %v296_v30 = vpop.eup %295  ;;  %214 = vst.msk [vmem:[#allocation2 + $0x60] sm:$0xff] %vm25_vm0, %v195_v27 }
 0x156   :  { %v298_v24 = vpop.eup %297  ;;  %v197_v25 = vmul.f32 %v296_v30, %v484_v41 }
 0x157   :  { %v199_v31 = vmul.f32 %v298_v24, %v490_v44 }
 0x158   :  { %215 = vst.msk [vmem:[#allocation2 + $0x68] sm:$0xff] %vm25_vm0, %v197_v25 }
 0x159   :  { %v300_v32 = vpop.eup %299  ;;  %216 = vst.msk [vmem:[#allocation2 + $0x70] sm:$0xff] %vm25_vm0, %v199_v31 }
 0x15a   :  { %v201_v33 = vmul.f32 %v300_v32, %v492_v45 }
 0x15c   :  { %217 = vst.msk [vmem:[#allocation2 + $0x78] sm:$0xff] %vm25_vm0, %v201_v33 }
 0x15d   :  { %312 = shalt.err (!%p309_p4)
}
 0x15e   :  { %s313_s13 = scalar_lea.hbm %s543_s1, 2048 }
 0x15f   :  { %p314_p5 = scmp.ne.s32.totalorder %s543_s1, %s313_s13  ;;  %p317_p6 = scmp.lt.u32.totalorder %s313_s13, %s543_s1 }
 0x161   :  { %p319_p7 = pnand %p317_p6, %p314_p5 }
 0x163   :  { %322 = shalt.err (!%p319_p7)
}
 0x164   :  { %s326_s18 = smov 128   ;;  %s327_s19 = smov 8  }
 0x165   :  { %229 = dma.vmem_to_hbm [thread:$0]  %s224_s9, 2048, %s543_s1, [#allocation3], %s326_s18, %s326_s18, %s327_s19  }
 0x166   :  { %323 = dma.done.wait [#allocation3], 2048  }
 0x167   :  { %324 = vsyncadd [#allocation3], 4294965248 }
 0x168   :  { %233 = vsyncpa [#allocation3], 1 }

</bundles_post_ra>
